<compile_context>
chip_gen: v7x
topology: tpu7x:2x2x1
jax: 0.10.0
libtpu: 0.0.40
codegen_flags: <defaults>
</compile_context>

<pallas_src>
import functools

import jax
import jax.numpy as jnp
from jax.experimental import pallas as pl
from jax.experimental.pallas import tpu as pltpu

LEAKY_SLOPE = 0.01  # nn.LeakyReLU default negative_slope


def _leaky_relu(x):
    return jnp.where(x > 0, x, LEAKY_SLOPE * x)


def _round_up(x, m):
    return ((x + m - 1) // m) * m


def _pad2(a, rows, cols):
    return jnp.pad(a, ((0, rows - a.shape[0]), (0, cols - a.shape[1])))


# --------------------------------------------------------------------------------------
# Kernels
# --------------------------------------------------------------------------------------
def mlp_kernel(x_ref, w_in_ref, b_in_ref, w_hid_ref, b_hid_ref, w_out_ref, b_out_ref,
               o_ref, h_scratch):
    """Grid = (batch_tile, hidden_layer).  One hidden layer processed per grid step.

    x_ref     : (TB, in_pad)        f32   (resident across layer axis)
    w_in_ref  : (in_pad, hid_pad)   bf16  (resident)     b_in_ref  : (1, hid_pad)  f32
    w_hid_ref : (1, hid_pad, hid_pad) bf16 (streamed)    b_hid_ref : (1, 1, hid_pad) f32
    w_out_ref : (hid_pad, out_pad)  bf16  (resident)     b_out_ref : (1, out_pad)  f32
    o_ref     : (TB, out_pad)       f32   (written only on the last layer step)
    h_scratch : (TB, hid_pad)       f32   persistent running activation
    """
    layer = pl.program_id(1)

    @pl.when(layer == 0)
    def _():
        h0 = jnp.dot(x_ref[...].astype(jnp.bfloat16), w_in_ref[...],
                     preferred_element_type=jnp.float32)
        h_scratch[...] = _leaky_relu(h0 + b_in_ref[...])

    # Dropout is identity in eval mode; then Linear(H,H) + LeakyReLU for this layer.
    h = jnp.dot(h_scratch[...].astype(jnp.bfloat16), w_hid_ref[0],
                preferred_element_type=jnp.float32)
    h_scratch[...] = _leaky_relu(h + b_hid_ref[0])

    @pl.when(layer == pl.num_programs(1) - 1)
    def _():
        out = jnp.dot(h_scratch[...].astype(jnp.bfloat16), w_out_ref[...],
                      preferred_element_type=jnp.float32) + b_out_ref[...]
        o_ref[...] = out.astype(o_ref.dtype)


def single_linear_kernel(x_ref, w_ref, b_ref, o_ref):
    """num_hidden == 0 path: the module is a single Linear(input_size, output_size)."""
    acc = jnp.dot(x_ref[...].astype(jnp.bfloat16), w_ref[...],
                  preferred_element_type=jnp.float32)
    o_ref[...] = (acc + b_ref[...]).astype(o_ref.dtype)


# --------------------------------------------------------------------------------------
# Wrappers
# --------------------------------------------------------------------------------------
def _vmem_estimate(tb, in_pad, hid_pad, out_pad):
    f4, bf2 = 4, 2
    per_step = (tb * in_pad * f4            # x tile
                + in_pad * hid_pad * bf2    # w_in
                + hid_pad * f4              # b_in
                + hid_pad * hid_pad * bf2   # one streamed hidden layer
                + hid_pad * f4              # its bias
                + hid_pad * out_pad * bf2   # w_out
                + out_pad * f4              # b_out
                + tb * out_pad * f4)        # out tile
    scratch = tb * hid_pad * f4
    return 2 * per_step + scratch           # x2 for double-buffering


def mlp_forward(x, params, *, num_hidden, block_batch=128):
    batch, input_size = x.shape

    # ---- num_hidden == 0: single Linear(input, output) --------------------------------
    if num_hidden == 0:
        w, b = params["w"], params["b"]
        output_size = w.shape[1]
        in_pad = _round_up(input_size, 128)
        out_pad = _round_up(output_size, 128)
        tb = min(block_batch, _round_up(batch, 8))
        batch_pad = _round_up(batch, tb)

        xp = _pad2(x.astype(jnp.float32), batch_pad, in_pad)
        wp = _pad2(w, in_pad, out_pad).astype(jnp.bfloat16)
        bp = _pad2(b, 1, out_pad).astype(jnp.float32)

        out = pl.pallas_call(
            single_linear_kernel,
            out_shape=jax.ShapeDtypeStruct((batch_pad, out_pad), jnp.float32),
            grid_spec=pltpu.PrefetchScalarGridSpec(
                num_scalar_prefetch=0,
                grid=(batch_pad // tb,),
                in_specs=[
                    pl.BlockSpec((tb, in_pad), lambda i: (i, 0)),
                    pl.BlockSpec((in_pad, out_pad), lambda i: (0, 0)),
                    pl.BlockSpec((1, out_pad), lambda i: (0, 0)),
                ],
                out_specs=pl.BlockSpec((tb, out_pad), lambda i: (i, 0)),
            ),
            compiler_params=pltpu.CompilerParams(
                dimension_semantics=("parallel",),
                vmem_limit_bytes=min(
                    max(_vmem_estimate(tb, in_pad, 128, out_pad), 16 << 20), 120 << 20),
            ),
        )(xp, wp, bp)
        return out[:batch, :output_size]

    # ---- num_hidden > 0 ----------------------------------------------------------------
    w_in, b_in = params["w_in"], params["b_in"]
    w_hid, b_hid = params["w_hid"], params["b_hid"]
    w_out, b_out = params["w_out"], params["b_out"]
    hidden_size = w_in.shape[1]
    output_size = w_out.shape[1]

    in_pad = _round_up(input_size, 128)
    hid_pad = _round_up(hidden_size, 128)
    out_pad = _round_up(output_size, 128)
    tb = min(block_batch, _round_up(batch, 8))
    batch_pad = _round_up(batch, tb)

    # Zero padding is exact: padded weight rows/cols are 0 and leaky_relu(0) == 0.
    xp = _pad2(x.astype(jnp.float32), batch_pad, in_pad)
    w_in_p = _pad2(w_in, in_pad, hid_pad).astype(jnp.bfloat16)
    b_in_p = _pad2(b_in, 1, hid_pad).astype(jnp.float32)
    w_hid_p = jnp.pad(w_hid, ((0, 0),
                              (0, hid_pad - hidden_size),
                              (0, hid_pad - hidden_size))).astype(jnp.bfloat16)
    b_hid_p = jnp.pad(b_hid, ((0, 0), (0, 0),
                              (0, hid_pad - hidden_size))).astype(jnp.float32)
    w_out_p = _pad2(w_out, hid_pad, out_pad).astype(jnp.bfloat16)
    b_out_p = _pad2(b_out, 1, out_pad).astype(jnp.float32)

    vmem_limit = min(max(_vmem_estimate(tb, in_pad, hid_pad, out_pad) + (4 << 20),
                         16 << 20), 120 << 20)

    out = pl.pallas_call(
        mlp_kernel,
        out_shape=jax.ShapeDtypeStruct((batch_pad, out_pad), jnp.float32),
        grid_spec=pltpu.PrefetchScalarGridSpec(
            num_scalar_prefetch=0,
            grid=(batch_pad // tb, num_hidden),
            in_specs=[
                pl.BlockSpec((tb, in_pad), lambda i, l: (i, 0)),           # x tile
                pl.BlockSpec((in_pad, hid_pad), lambda i, l: (0, 0)),      # w_in (resident)
                pl.BlockSpec((1, hid_pad), lambda i, l: (0, 0)),           # b_in
                pl.BlockSpec((1, hid_pad, hid_pad), lambda i, l: (l, 0, 0)),  # streamed layer W
                pl.BlockSpec((1, 1, hid_pad), lambda i, l: (l, 0, 0)),        # streamed layer b
                pl.BlockSpec((hid_pad, out_pad), lambda i, l: (0, 0)),     # w_out (resident)
                pl.BlockSpec((1, out_pad), lambda i, l: (0, 0)),           # b_out
            ],
            out_specs=pl.BlockSpec((tb, out_pad), lambda i, l: (i, 0)),
            scratch_shapes=[pltpu.VMEM((tb, hid_pad), jnp.float32)],
        ),
        compiler_params=pltpu.CompilerParams(
            dimension_semantics=("parallel", "arbitrary"),
            vmem_limit_bytes=vmem_limit,
        ),
    )(xp, w_in_p, b_in_p, w_hid_p, b_hid_p, w_out_p, b_out_p)

    return out[:batch, :output_size]


# --------------------------------------------------------------------------------------
# Init (mimics nn.Linear U(-1/sqrt(fan_in), 1/sqrt(fan_in))), weights stored (in, out)
# --------------------------------------------------------------------------------------
def _linear_init(k, fan_in, fan_out):
    kw, kb = jax.random.split(k)
    bound = 1.0 / jnp.sqrt(fan_in)
    w = jax.random.uniform(kw, (fan_in, fan_out), jnp.float32, -bound, bound)
    b = jax.random.uniform(kb, (1, fan_out), jnp.float32, -bound, bound)
    return w, b


def init_mlp_params(key, input_size, hidden_size, num_hidden, output_size):
    if num_hidden == 0:
        w, b = _linear_init(key, input_size, output_size)
        return {"w": w, "b": b}

    keys = jax.random.split(key, num_hidden + 2)  # distinct key per layer (fixes reuse bug)
    w_in, b_in = _linear_init(keys[0], input_size, hidden_size)
    w_hid_list, b_hid_list = [], []
    for i in range(num_hidden):
        w, b = _linear_init(keys[1 + i], hidden_size, hidden_size)
        w_hid_list.append(w)
        b_hid_list.append(b)
    w_out, b_out = _linear_init(keys[-1], hidden_size, output_size)
    return {"w_in": w_in, "b_in": b_in,
            "w_hid": jnp.stack(w_hid_list), "b_hid": jnp.stack(b_hid_list),
            "w_out": w_out, "b_out": b_out}


def mlp_reference(x, params, num_hidden):
    """Plain-JAX reference (eval mode), mimicking the kernel's bf16 matmul operands."""
    bf = lambda a: a.astype(jnp.bfloat16).astype(jnp.float32)
    if num_hidden == 0:
        return bf(x) @ bf(params["w"]) + params["b"]
    h = _leaky_relu(bf(x) @ bf(params["w_in"]) + params["b_in"])
    for i in range(num_hidden):
        h = _leaky_relu(bf(h) @ bf(params["w_hid"][i]) + params["b_hid"][i])
    return bf(h) @ bf(params["w_out"]) + params["b_out"]


# --------------------------------------------------------------------------------------
if __name__ == "__main__":
    # Case 1: small demo config matching the module defaults.
    input_size, hidden_size, num_hidden, output_size = 16, 32, 2, 8
    batch = 16
    kx, kp = jax.random.split(jax.random.PRNGKey(0))
    x = jax.random.normal(kx, (batch, input_size), jnp.float32)
    params = init_mlp_params(kp, input_size, hidden_size, num_hidden, output_size)

    out = jax.block_until_ready(mlp_forward(x, params, num_hidden=num_hidden))
    ref = mlp_reference(x, params, num_hidden)
    assert out.shape == (batch, output_size), out.shape
    assert jnp.allclose(out, ref, atol=1e-2, rtol=1e-2), float(jnp.max(jnp.abs(out - ref)))

    # Case 2: exercises a multi-tile batch grid (2 batch tiles) and a deeper layer stream.
    b2, i2, h2, nh2, o2 = 200, 48, 96, 3, 24
    k2x, k2p = jax.random.split(jax.random.PRNGKey(1))
    x2 = jax.random.normal(k2x, (b2, i2), jnp.float32)
    p2 = init_mlp_params(k2p, i2, h2, nh2, o2)
    out2 = jax.block_until_ready(mlp_forward(x2, p2, num_hidden=nh2, block_batch=128))
    ref2 = mlp_reference(x2, p2, nh2)
    assert out2.shape == (b2, o2), out2.shape
    assert jnp.allclose(out2, ref2, atol=1e-2, rtol=1e-2), float(jnp.max(jnp.abs(out2 - ref2)))

    # Case 3: num_hidden == 0 branch (module degenerates to a single Linear).
    p0 = init_mlp_params(jax.random.PRNGKey(2), 16, 32, 0, 8)
    x0 = jax.random.normal(jax.random.PRNGKey(3), (8, 16), jnp.float32)
    out0 = jax.block_until_ready(mlp_forward(x0, p0, num_hidden=0))
    ref0 = mlp_reference(x0, p0, 0)
    assert jnp.allclose(out0, ref0, atol=1e-2, rtol=1e-2), float(jnp.max(jnp.abs(out0 - ref0)))

    print("KERNEL_OK")
</pallas_src>

<mosaic_0001>
module attributes {stable_mosaic.version = 11 : i64} {
  func.func @mlp_kernel(%arg0: i32, %arg1: i32, %arg2: memref<16x128xf32, #tpu.memory_space<vmem>>, %arg3: memref<128x128xbf16, #tpu.memory_space<vmem>>, %arg4: memref<1x128xf32, #tpu.memory_space<vmem>>, %arg5: memref<1x128x128xbf16, #tpu.memory_space<vmem>>, %arg6: memref<1x1x128xf32, #tpu.memory_space<vmem>>, %arg7: memref<128x128xbf16, #tpu.memory_space<vmem>>, %arg8: memref<1x128xf32, #tpu.memory_space<vmem>>, %arg9: memref<16x128xf32, #tpu.memory_space<vmem>>, %arg10: memref<16x128xf32, #tpu.memory_space<vmem>>) attributes {dimension_semantics = [#tpu.dimension_semantics<parallel>, #tpu.dimension_semantics<arbitrary>], iteration_bounds = array<i64: 1, 2>, scalar_prefetch = 0 : i64, scratch_operands = 1 : i64, tpu.core_type = #tpu.core_type<tc>, window_params = [{transform_indices = @transform_0, window_bounds = array<i64: 16, 128>}, {pipeline_mode = #tpu.pipeline_mode<synchronous>, transform_indices = @transform_1, window_bounds = array<i64: 128, 128>}, {pipeline_mode = #tpu.pipeline_mode<synchronous>, transform_indices = @transform_2, window_bounds = array<i64: 1, 128>}, {transform_indices = @transform_3, window_bounds = array<i64: 1, 128, 128>}, {transform_indices = @transform_4, window_bounds = array<i64: 1, 1, 128>}, {pipeline_mode = #tpu.pipeline_mode<synchronous>, transform_indices = @transform_5, window_bounds = array<i64: 128, 128>}, {pipeline_mode = #tpu.pipeline_mode<synchronous>, transform_indices = @transform_6, window_bounds = array<i64: 1, 128>}, {transform_indices = @transform_7, window_bounds = array<i64: 16, 128>}]} {
    %c0_i32 = arith.constant 0 : i32
    %0 = arith.cmpi eq, %arg1, %c0_i32 : i32
    %1 = arith.extui %0 : i1 to i32
    %c0_i32_0 = arith.constant 0 : i32
    %2 = arith.cmpi ne, %1, %c0_i32_0 : i32
    scf.if %2 {
      %c0_13 = arith.constant 0 : index
      %c0_14 = arith.constant 0 : index
      %21 = vector.load %arg2[%c0_13, %c0_14] : memref<16x128xf32, #tpu.memory_space<vmem>>, vector<16x128xf32>
      %22 = arith.truncf %21 : vector<16x128xf32> to vector<16x128xbf16>
      %c0_15 = arith.constant 0 : index
      %c0_16 = arith.constant 0 : index
      %23 = vector.load %arg3[%c0_15, %c0_16] : memref<128x128xbf16, #tpu.memory_space<vmem>>, vector<128x128xbf16>
      %cst_17 = arith.constant dense<0.000000e+00> : vector<16x128xf32>
      %24 = tpu.matmul %22, %23, %cst_17 {dimension_numbers = #tpu.dot_dimension_numbers<[1], [0], [0], [1], [0, 0, 1, 1], [], []>} : vector<16x128xbf16>, vector<128x128xbf16>, vector<16x128xf32> -> vector<16x128xf32>
      %c0_18 = arith.constant 0 : index
      %c0_19 = arith.constant 0 : index
      %25 = vector.load %arg4[%c0_18, %c0_19] : memref<1x128xf32, #tpu.memory_space<vmem>>, vector<1x128xf32>
      %26 = vector.broadcast %25 : vector<1x128xf32> to vector<16x128xf32>
      %27 = arith.addf %24, %26 : vector<16x128xf32>
      %cst_20 = arith.constant 0.000000e+00 : f32
      %28 = vector.broadcast %cst_20 : f32 to vector<16x128xf32>
      %29 = arith.cmpf ogt, %27, %28 : vector<16x128xf32>
      %cst_21 = arith.constant 0.00999999977 : f32
      %30 = vector.broadcast %cst_21 : f32 to vector<16x128xf32>
      %31 = arith.mulf %30, %27 : vector<16x128xf32>
      %32 = arith.select %29, %27, %31 : vector<16x128xi1>, vector<16x128xf32>
      %c0_22 = arith.constant 0 : index
      %c0_23 = arith.constant 0 : index
      %33 = vector.load %arg10[%c0_22, %c0_23] : memref<16x128xf32, #tpu.memory_space<vmem>>, vector<16x128xf32>
      tpu.vector_store %arg10[%c0_22, %c0_23], %32 {strides = array<i32>} : memref<16x128xf32, #tpu.memory_space<vmem>>, vector<16x128xf32>,
    } else {
    }
    %c0 = arith.constant 0 : index
    %c0_1 = arith.constant 0 : index
    %3 = vector.load %arg10[%c0, %c0_1] : memref<16x128xf32, #tpu.memory_space<vmem>>, vector<16x128xf32>
    %4 = arith.truncf %3 : vector<16x128xf32> to vector<16x128xbf16>
    %c0_2 = arith.constant 0 : index
    %c0_3 = arith.constant 0 : index
    %c0_4 = arith.constant 0 : index
    %5 = vector.load %arg5[%c0_2, %c0_3, %c0_4] : memref<1x128x128xbf16, #tpu.memory_space<vmem>>, vector<1x128x128xbf16>
    %6 = vector.shape_cast %5 : vector<1x128x128xbf16> to vector<128x128xbf16>
    %cst = arith.constant dense<0.000000e+00> : vector<16x128xf32>
    %7 = tpu.matmul %4, %6, %cst {dimension_numbers = #tpu.dot_dimension_numbers<[1], [0], [0], [1], [0, 0, 1, 1], [], []>} : vector<16x128xbf16>, vector<128x128xbf16>, vector<16x128xf32> -> vector<16x128xf32>
    %c0_5 = arith.constant 0 : index
    %c0_6 = arith.constant 0 : index
    %c0_7 = arith.constant 0 : index
    %8 = vector.load %arg6[%c0_5, %c0_6, %c0_7] : memref<1x1x128xf32, #tpu.memory_space<vmem>>, vector<1x1x128xf32>
    %9 = vector.shape_cast %8 : vector<1x1x128xf32> to vector<1x128xf32>
    %10 = vector.broadcast %9 : vector<1x128xf32> to vector<16x128xf32>
    %11 = arith.addf %7, %10 : vector<16x128xf32>
    %cst_8 = arith.constant 0.000000e+00 : f32
    %12 = vector.broadcast %cst_8 : f32 to vector<16x128xf32>
    %13 = arith.cmpf ogt, %11, %12 : vector<16x128xf32>
    %cst_9 = arith.constant 0.00999999977 : f32
    %14 = vector.broadcast %cst_9 : f32 to vector<16x128xf32>
    %15 = arith.mulf %14, %11 : vector<16x128xf32>
    %16 = arith.select %13, %11, %15 : vector<16x128xi1>, vector<16x128xf32>
    %c0_10 = arith.constant 0 : index
    %c0_11 = arith.constant 0 : index
    %17 = vector.load %arg10[%c0_10, %c0_11] : memref<16x128xf32, #tpu.memory_space<vmem>>, vector<16x128xf32>
    tpu.vector_store %arg10[%c0_10, %c0_11], %16 {strides = array<i32>} : memref<16x128xf32, #tpu.memory_space<vmem>>, vector<16x128xf32>,
    %c1_i32 = arith.constant 1 : i32
    %18 = arith.cmpi eq, %arg1, %c1_i32 : i32
    %19 = arith.extui %18 : i1 to i32
    %c0_i32_12 = arith.constant 0 : i32
    %20 = arith.cmpi ne, %19, %c0_i32_12 : i32
    scf.if %20 {
      %c0_13 = arith.constant 0 : index
      %c0_14 = arith.constant 0 : index
      %21 = vector.load %arg10[%c0_13, %c0_14] : memref<16x128xf32, #tpu.memory_space<vmem>>, vector<16x128xf32>
      %22 = arith.truncf %21 : vector<16x128xf32> to vector<16x128xbf16>
      %c0_15 = arith.constant 0 : index
      %c0_16 = arith.constant 0 : index
      %23 = vector.load %arg7[%c0_15, %c0_16] : memref<128x128xbf16, #tpu.memory_space<vmem>>, vector<128x128xbf16>
      %cst_17 = arith.constant dense<0.000000e+00> : vector<16x128xf32>
      %24 = tpu.matmul %22, %23, %cst_17 {dimension_numbers = #tpu.dot_dimension_numbers<[1], [0], [0], [1], [0, 0, 1, 1], [], []>} : vector<16x128xbf16>, vector<128x128xbf16>, vector<16x128xf32> -> vector<16x128xf32>
      %c0_18 = arith.constant 0 : index
      %c0_19 = arith.constant 0 : index
      %25 = vector.load %arg8[%c0_18, %c0_19] : memref<1x128xf32, #tpu.memory_space<vmem>>, vector<1x128xf32>
      %26 = vector.broadcast %25 : vector<1x128xf32> to vector<16x128xf32>
      %27 = arith.addf %24, %26 : vector<16x128xf32>
      %c0_20 = arith.constant 0 : index
      %c0_21 = arith.constant 0 : index
      %28 = vector.load %arg9[%c0_20, %c0_21] : memref<16x128xf32, #tpu.memory_space<vmem>>, vector<16x128xf32>
      tpu.vector_store %arg9[%c0_20, %c0_21], %27 {strides = array<i32>} : memref<16x128xf32, #tpu.memory_space<vmem>>, vector<16x128xf32>,
    } else {
    }
    return
  }
  func.func @transform_0(%arg0: i32, %arg1: i32) -> (i32, i32) {
    %c0_i32 = arith.constant 0 : i32
    %c0_i32_0 = arith.constant 0 : i32
    return %arg0, %c0_i32 : i32, i32
  }
  func.func @transform_1(%arg0: i32, %arg1: i32) -> (i32, i32) {
    %c0_i32 = arith.constant 0 : i32
    %c0_i32_0 = arith.constant 0 : i32
    %c0_i32_1 = arith.constant 0 : i32
    return %c0_i32, %c0_i32_0 : i32, i32
  }
  func.func @transform_2(%arg0: i32, %arg1: i32) -> (i32, i32) {
    %c0_i32 = arith.constant 0 : i32
    %c0_i32_0 = arith.constant 0 : i32
    %c0_i32_1 = arith.constant 0 : i32
    return %c0_i32, %c0_i32_0 : i32, i32
  }
  func.func @transform_3(%arg0: i32, %arg1: i32) -> (i32, i32, i32) {
    %c0_i32 = arith.constant 0 : i32
    %c0_i32_0 = arith.constant 0 : i32
    %c0_i32_1 = arith.constant 0 : i32
    return %arg1, %c0_i32, %c0_i32_0 : i32, i32, i32
  }
  func.func @transform_4(%arg0: i32, %arg1: i32) -> (i32, i32, i32) {
    %c0_i32 = arith.constant 0 : i32
    %c0_i32_0 = arith.constant 0 : i32
    %c0_i32_1 = arith.constant 0 : i32
    return %arg1, %c0_i32, %c0_i32_0 : i32, i32, i32
  }
  func.func @transform_5(%arg0: i32, %arg1: i32) -> (i32, i32) {
    %c0_i32 = arith.constant 0 : i32
    %c0_i32_0 = arith.constant 0 : i32
    %c0_i32_1 = arith.constant 0 : i32
    return %c0_i32, %c0_i32_0 : i32, i32
  }
  func.func @transform_6(%arg0: i32, %arg1: i32) -> (i32, i32) {
    %c0_i32 = arith.constant 0 : i32
    %c0_i32_0 = arith.constant 0 : i32
    %c0_i32_1 = arith.constant 0 : i32
    return %c0_i32, %c0_i32_0 : i32, i32
  }
  func.func @transform_7(%arg0: i32, %arg1: i32) -> (i32, i32) {
    %c0_i32 = arith.constant 0 : i32
    %c0_i32_0 = arith.constant 0 : i32
    return %arg0, %c0_i32 : i32, i32
  }
}

</mosaic_0001>

<bundles_post_ra>
// kernel: tpu_custom_call.1
= control target key start
LH: loop header
LB: loop body
LE: loop exit
PB: predicated region body
PF: predicated region fallthrough
CT: control target
= control target key end

     0   :  { %s1649_s0 = inlined_call_operand.hbm [shape: f32[16,128], index: 0, kind: input, shape index: {}]   ;;  %s1650_s1 = inlined_call_operand.hbm [shape: bf16[128,128], index: 1, kind: input, shape index: {}]   ;;  %s1651_s2 = inlined_call_operand.vmem [shape: f32[1,128], index: 2, kind: input, shape index: {}]   ;;  %s1652_s3 = inlined_call_operand.hbm [shape: bf16[2,128,128], index: 3, kind: input, shape index: {}]   ;;  %s1653_s4 = inlined_call_operand.vmem [shape: f32[2,1,128], index: 4, kind: input, shape index: {}]   ;;  %s1654_s5 = inlined_call_operand.hbm [shape: bf16[128,128], index: 5, kind: input, shape index: {}]   ;;  %s1655_s6 = inlined_call_operand.vmem [shape: f32[1,128], index: 6, kind: input, shape index: {}]   ;;  %s1656_s7 = inlined_call_operand.hbm [shape: f32[16,128], index: 7, kind: output, shape index: {}]  }
   0x1   :  { %1662 = sst [smem:[#allocation16_spill]] %s1649_s0 }
   0x2   :  { %1663 = sst [smem:[#allocation17_spill]] %s1655_s6 }
   0x3   :  { %1664 = sst [smem:[#allocation18_spill]] %s1656_s7 }
   0x4   :  { %12 = vsyncpa [#allocation4], 0 }
   0x5   :  { %13 = vsyncpa [#allocation7], 0 }
   0x6   :  { %14 = vsyncpa [#allocation5], 0  ;;  %s1380_s24 = smov 0   ;;  %s1382_s25 = smov 0  }
   0x7   :  { %s1384_s26 = smov 0   ;;  %s1386_s27 = smov 0  }
   0x8   :  { %s1388_s28 = smov 0   ;;  %s1390_s29 = smov 0  }
   0x9 LB: > { %s1409_s30 = sadd.s32 4294967295, %s1321_s29   ;;  %p114_p0 = scmp.ne.s32.totalorder %s1309_s26, %s1305_s25  ;;  %s1321_s29 = sphi %s1390_s29, %s20_s29   ;;  %s1317_s28 = sphi %s1388_s28, %s1687_s28   ;;  %s1313_s27 = sphi %s1386_s27, %s1686_s27   ;;  %s1309_s26 = sphi %s1384_s26, %s1685_s26   ;;  %s1305_s25 = sphi %s1382_s25, %s1684_s25   ;;  %s1301_s24 = sphi %s1380_s24, %s1683_s24  }
   0xa   : > { %p115_p1 = scmp.eq.s32.totalorder %s1321_s29, 0  ;;  %p120_p2 = scmp.ne.s32.totalorder %s1305_s25, %s1301_s24 }
   0xb   : > { %p1657_p3 = scmp.eq.s32.totalorder %s1409_s30, 0  ;;  %p852_p4 = scmp.ge.s32.totalorder %s1321_s29, 1 }
   0xc   : > { %p116_p5 = por %p115_p1, %p114_p0  ;;  %p225_p6 = scmp.lt.s32.totalorder %s1321_s29, 3 }
   0xd   : > { %p1420_p7 = por %p1657_p3, %p120_p2  ;;  %s1323_s10 = smov [#allocation3]  }
   0xe   : > { %p1424_p8 = pnand %p852_p4, %p225_p6  ;;  %s240_s11 = sshll.u32 %s1323_s10, 4  ;;  %s241_s11 = int_to_ptr.vmem [resolvable:$true] %s240_s11 }
   0xf   : > { %s1665_s8 = scalar_select %p1420_p7, 1, 0 }
  0x10   : > { %s1666_s9 = scalar_select %p1424_p8, 1, 0 }
  0x11   : > { %p1004_p9 = pneg %p1424_p8  ;;  %p1021_p11 = scmp.lt.s32.totalorder %s1321_s29, 2 }
  0x12   : > { %s1669_s0 = sld [smem:[#allocation16_spill]] }
  0x13   : > { %p1432_p10 = pnand %p1004_p9, %p1657_p3  ;;  %p1437_p12 = pnand %p1021_p11, %p116_p5 }
  0x15   : > { %s1668_s13 = scalar_select %p1437_p12, 1, 0 }
  0x16   : > { %p1449_p0 = pneg %p1432_p10 }
  0x18   : > { %s1115_s16 = scalar_lea.hbm %s1669_s0, 256 }
  0x19   : > { %p1116_p13 = scmp.ne.s32.totalorder %s1669_s0, %s1115_s16  ;;  %p1122_p4 = scmp.lt.u32.totalorder %s1115_s16, %s1669_s0 }
  0x1b   : > { %p1118_p1 = pnand %p1449_p0, %p1116_p13 }
  0x1d   : > { %p1119_p2 = pneg %p1118_p1 }
  0x1f   : > { %p1124_p5 = pnand %p1122_p4, %p1119_p2 }
  0x21   : > { %1127 = shalt.err (!%p1124_p5)
}
  0x22   : > { %s1128_s22 = scalar_lea.vmem %s241_s11, 256  ;;  %p1136_p3 = scmp.lt.s32.totalorder %s241_s11, %s241_s11 }
  0x23   : > { %p1129_p6 = scmp.ne.s32.totalorder %s241_s11, %s1128_s22  ;;  %p1137_p7 = scmp.lt.s32.totalorder %s1128_s22, %s1128_s22 }
  0x25   : > { %p1131_p9 = pnand %p1129_p6, %p1449_p0  ;;  %p1138_p8 = por %p1137_p7, %p1136_p3 }
  0x27   : > { %p1132_p11 = pneg %p1131_p9 }
  0x29   : > { %p1139_p12 = pnand %p1138_p8, %p1132_p11 }
  0x2b   : > { %1142 = shalt.err (!%p1139_p12)
}
  0x2c   : > { %s1324_s23 = smov 128   ;;  %s1325_s24 = smov 8  }
  0x2d   : > { %1007 = dma.hbm_to_vmem [thread:$0]  (!%p1432_p10), %s1669_s0, 256, %s241_s11, [#allocation4], %s1324_s23, %s1324_s23, %s1325_s24  }
  0x2e   : > { %s1326_s15 = smov [#allocation6]   ;;  %s1143_s20 = scalar_lea.hbm %s1650_s1, 1024 }
  0x2f   : > { %s253_s16 = sshll.u32 %s1326_s15, 4  ;;  %p1144_p3 = scmp.ne.s32.totalorder %s1650_s1, %s1143_s20  ;;  %s254_s16 = int_to_ptr.vmem [resolvable:$true] %s253_s16 }
  0x30   : > { %p1150_p12 = scmp.lt.u32.totalorder %s1143_s20, %s1650_s1 }
  0x31   : > { %p1146_p7 = pnand %p1144_p3, %p1449_p0 }
  0x33   : > { %p1147_p8 = pneg %p1146_p7 }
  0x35   : > { %p1152_p13 = pnand %p1150_p12, %p1147_p8 }
  0x37   : > { %1155 = shalt.err (!%p1152_p13)
}
  0x38   : > { %s1156_s11 = scalar_lea.vmem %s254_s16, 1024  ;;  %p1164_p5 = scmp.lt.s32.totalorder %s254_s16, %s254_s16 }
  0x39   : > { %p1157_p1 = scmp.ne.s32.totalorder %s254_s16, %s1156_s11  ;;  %p1165_p6 = scmp.lt.s32.totalorder %s1156_s11, %s1156_s11 }
  0x3b   : > { %p1159_p2 = pnand %p1157_p1, %p1449_p0  ;;  %p1166_p9 = por %p1165_p6, %p1164_p5 }
  0x3d   : > { %p1160_p4 = pneg %p1159_p2 }
  0x3f   : > { %p1167_p11 = pnand %p1166_p9, %p1160_p4 }
  0x41   : > { %1170 = shalt.err (!%p1167_p11)
}
  0x42   : > { %s1327_s23 = smov 64   ;;  %s1328_s24 = smov 4  }
  0x43   : > { %1010 = dma.hbm_to_vmem [thread:$0]  (!%p1432_p10), %s1650_s1, 1024, %s254_s16, [#allocation7], %s1327_s23, %s1327_s23, %s1328_s24  }
  0x44   : > { %s1329_s10 = smov [#allocation9]   ;;  %s29_s15 = sadd.s32 1, %s1317_s28 }
  0x45   : > { %s269_s14 = sshll.u32 %s1329_s10, 4  ;;  %s1171_s20 = scalar_lea.hbm %s1654_s5, 1024  ;;  %s270_s14 = int_to_ptr.vmem [resolvable:$true] %s269_s14 }
  0x46   : > { %p1172_p3 = scmp.ne.s32.totalorder %s1654_s5, %s1171_s20  ;;  %p1178_p12 = scmp.lt.u32.totalorder %s1171_s20, %s1654_s5 }
  0x48   : > { %p1174_p7 = pnand %p1172_p3, %p1449_p0 }
  0x4a   : > { %p1175_p8 = pneg %p1174_p7 }
  0x4c   : > { %p1180_p13 = pnand %p1178_p12, %p1175_p8 }
  0x4e   : > { %1183 = shalt.err (!%p1180_p13)
}
  0x4f   : > { %s1184_s16 = scalar_lea.vmem %s270_s14, 1024  ;;  %p1192_p5 = scmp.lt.s32.totalorder %s270_s14, %s270_s14 }
  0x50   : > { %p1185_p1 = scmp.ne.s32.totalorder %s270_s14, %s1184_s16  ;;  %p1193_p6 = scmp.lt.s32.totalorder %s1184_s16, %s1184_s16 }
  0x52   : > { %p1187_p2 = pnand %p1185_p1, %p1449_p0  ;;  %p1194_p9 = por %p1193_p6, %p1192_p5 }
  0x54   : > { %p1188_p4 = pneg %p1187_p2 }
  0x56   : > { %p1195_p11 = pnand %p1194_p9, %p1188_p4 }
  0x58   : > { %1198 = shalt.err (!%p1195_p11)
}
  0x59   : > { %1013 = dma.hbm_to_vmem [thread:$0]  (!%p1432_p10), %s1654_s5, 1024, %s270_s14, [#allocation7], %s1327_s23, %s1327_s23, %s1328_s24  }
  0x5a   : > { %p30_p0 = scmp.ge.s32.totalorder %s29_s15, 2  ;;  %s107_s19 = sadd.s32 1, %s1309_s26 }
  0x5b   : > { %s286_s7 = sand.u32 1, %s1321_s29   ;;  %s288_s10 = sand.u32 1, %s1309_s26  }
  0x5c   : > { %s1689_s15 = smov (%p30_p0, %s29_s15), 0  ;;  %s857_s12 = sshll.u32 %s288_s10, 6 }
  0x5d   : > { %s104_s17 = ssub.s32 %s1317_s28, %s1689_s15  ;;  %s898_s18 = sshll.u32 %s1317_s28, 10 }
  0x5e   : > { %p105_p3 = scmp.eq.s32.totalorder %s104_s17, 0  ;;  %s1519_s22 = scalar_lea.hbm %s1652_s3, %s898_s18 }
  0x5f   : > { %s290_s14 = scalar_lea.vmem [#allocation8], %s857_s12  ;;  %s1526_s0 = scalar_lea.sflag [#allocation4], %s286_s7 }
  0x60   : > { %s297_s11 = sshll.u32 %s290_s14, 4  ;;  %s1199_s6 = scalar_lea.hbm %s1519_s22, 1024  ;;  %s1524_s11 = int_to_ptr.vmem [resolvable:$true] %s297_s11 }
  0x61   : > { %s1522_s16 = scalar_select %p105_p3, %s1309_s26, %s107_s19  }
  0x62   : > { %p1200_p10 = scmp.ne.s32.totalorder %s1519_s22, %s1199_s6  ;;  %p1671_p7 = scmp.ne.s32.totalorder %s1668_s13, 0 }
  0x63   : > { %s1204_s18 = scalar_lea.hbm %s1652_s3, 2048  ;;  %p1205_p1 = scmp.lt.u32.totalorder %s1519_s22, %s1652_s3 }
  0x64   : > { %p1201_p8 = pneg %p1671_p7  ;;  %p1206_p2 = scmp.lt.u32.totalorder %s1204_s18, %s1199_s6 }
  0x65   : > { %p1208_p5 = scmp.lt.u32.totalorder %s1199_s6, %s1519_s22 }
  0x66   : > { %p1202_p12 = pnand %p1201_p8, %p1200_p10  ;;  %p1207_p4 = por %p1206_p2, %p1205_p1 }
  0x68   : > { %p1203_p13 = pneg %p1202_p12  ;;  %p1209_p6 = por %p1208_p5, %p1207_p4 }
  0x6a   : > { %p1210_p9 = pnand %p1209_p6, %p1203_p13 }
  0x6c   : > { %1213 = shalt.err (!%p1210_p9)
}
  0x6d   : > { %s1214_s19 = scalar_lea.vmem %s1524_s11, 1024  ;;  %s1330_s7 = smov [#allocation8]  }
  0x6e   : > { %p1215_p11 = scmp.ne.s32.totalorder %s1524_s11, %s1214_s19  ;;  %s1219_s21 = sshll.u32 %s1330_s7, 4  ;;  %s1220_s21 = int_to_ptr.vmem [resolvable:$false] %s1219_s21 }
  0x6f   : > { %s1221_s14 = scalar_lea.vmem %s1220_s21, 2048  ;;  %p1222_p10 = scmp.lt.s32.totalorder %s1524_s11, %s1220_s21 }
  0x70   : > { %p1217_p0 = pnand %p1215_p11, %p1201_p8  ;;  %p1223_p12 = scmp.lt.s32.totalorder %s1221_s14, %s1214_s19 }
  0x72   : > { %p1218_p3 = pneg %p1217_p0  ;;  %p1224_p1 = por %p1223_p12, %p1222_p10 }
  0x74   : > { %p1225_p2 = pnand %p1224_p1, %p1218_p3 }
  0x76   : > { %1228 = shalt.err (!%p1225_p2)
}
  0x77   : > { %1017 = dma.hbm_to_vmem [thread:$0]  (!%p1671_p7), %s1519_s22, 1024, %s1524_s11, %s1526_s0, %s1327_s23, %s1327_s23, %s1328_s24  }
  0x78   : > { %p1672_p8 = scmp.ne.s32.totalorder %s1666_s9, 0 }
  0x79   : > { %p1673_p13 = scmp.eq.s32.totalorder (!%p1672_p8), %s1409_s30, 0 }
  0x7a   : > { %315 = sbr.rel (%p1672_p8) target bundleno = 908 (0x38c), region = 48 }
  0x81   : > { %1280 = dma.done.wait (%p1673_p13), [#allocation4], 256   ;;  %p1674_p4 = pmov %p1673_p13 }
  0x83   : > { %1282 = vsyncadd (%p1674_p4), [#allocation4], 4294967040  ;;  %p1675_p5 = pmov %p1674_p4 }
  0x84   : > { %p1676_p6 = pmov %p1674_p4 }
  0x85   : > { %1284 = dma.done.wait (%p1675_p5), [#allocation7], 1024  }
  0x86   : > { %1286 = vsyncadd (%p1676_p6), [#allocation7], 4294966272  ;;  %s325_s13 = sand.u32 1, %s1409_s30   ;;  %s327_s23 = sand.u32 1, %s1305_s25  }
  0x87   : > { %s863_s24 = sshll.u32 %s327_s23, 6  ;;  %s326_s9 = scalar_lea.sflag [#allocation4], %s325_s13 }
  0x88   : > { %s1569_s22 = scalar_lea.vmem [#allocation8], %s863_s24  ;;  %p1677_p7 = scmp.ne.s32.totalorder %s1665_s8, 0 }
  0x8a   : > { %1288 = dma.done.wait (%p1677_p7), %s326_s9, 1024  }
  0x8b   : > { %1290 = vsyncadd (%p1677_p7), %s326_s9, 4294966272  ;;  %p1678_p9 = pmov %p1674_p4 }
  0x8c   : > { %p1679_p11 = pmov %p1674_p4 }
  0x8d   : > { %1292 = dma.done.wait (%p1678_p9), [#allocation7], 1024  }
  0x8e   : > { %1294 = vsyncadd (%p1679_p11), [#allocation7], 4294966272  ;;  %p363_p0 = scmp.lt.s32.totalorder %s1313_s27, 1  ;;  %p865_p3 = scmp.ne.s32.totalorder %s1313_s27, 0 }
  0x8f   : > { %v1091_v0 = vld [vmem:[#allocation6] sm:$0xff] (!%p865_p3)   ;;  %v1331_v1 = vmov (!%p865_p3), 0.0   ;;  %v1092_v2 = vld [vmem:[#allocation6 + $0x8] sm:$0xff] (!%p865_p3)   ;;  %vm1332_vm0 = vmmov (!%p865_p3), 0   ;;  %v1093_v3 = vld [vmem:[#allocation6 + $0x10] sm:$0xff] (!%p865_p3)  }
  0x90   : > { %s1581_s11 = scalar_select %p363_p0, %s1313_s27, 1 }
  0x91   : > { %371 = sbr.rel (%p865_p3) target bundleno = 397 (0x18d), region = 68  ;;  %926 = vmatprep.subr.bf16.mxu0 (!%p865_p3), %v1331_v1  ;;  %942 = vmatprep.mubr.msk.bf16.mxu0 (!%p865_p3), %vm1332_vm0, %v1331_v1  ;;  %v1094_v4 = vld [vmem:[#allocation6 + $0x18] sm:$0xff] (!%p865_p3)   ;;  %v1095_v5 = vld [vmem:[#allocation6 + $0x20] sm:$0xff] (!%p865_p3)   ;;  %v1096_v6 = vld [vmem:[#allocation6 + $0x28] sm:$0xff] (!%p865_p3)  }
  0x92   : > { %s365_s10 = scalar_lea.vmem %s1653_s4, %s1581_s11  ;;  %927 = vmatpush3.bf16.msra.mxu0 (!%p865_p3), %v1091_v0  ;;  %v1097_v7 = vld [vmem:[#allocation6 + $0x30] sm:$0xff] (!%p865_p3)   ;;  %v1098_v8 = vld [vmem:[#allocation6 + $0x38] sm:$0xff] (!%p865_p3)   ;;  %v866_v12 = vld [vmem:[%s1651_s2] ss:$0 sm:$0xff] (!%p865_p3) }
  0x93   : > { %928 = vmatprep.subr.bf16.mxu0 (!%p865_p3), %v1331_v1  ;;  %v372_v9 = vld [vmem:[#allocation3] sm:$0xff] (!%p865_p3)  ;;  %v373_v10 = vld [vmem:[#allocation3 + $0x8] sm:$0xff] (!%p865_p3) }
  0x94   : > { %v374_v11 = vpack.c.bf16 (!%p865_p3), %v373_v10, %v372_v9 }
  0x96   : > { %929 = vmatpush3.bf16.msra.mxu0 (!%p865_p3), %v1092_v2 }
  0x97   : > { %930 = vmatprep.subr.bf16.mxu0 (!%p865_p3), %v1331_v1 }
  0x9a   : > { %931 = vmatpush3.bf16.msra.mxu0 %v1093_v3 }
  0x9b   : > { %932 = vmatprep.subr.bf16.mxu0 %v1331_v1 }
  0x9e   : > { %933 = vmatpush3.bf16.msra.mxu0 %v1094_v4 }
  0x9f   : > { %934 = vmatprep.subr.bf16.mxu0 %v1331_v1 }
  0xa2   : > { %935 = vmatpush3.bf16.msra.mxu0 %v1095_v5 }
  0xa3   : > { %936 = vmatprep.subr.bf16.mxu0 %v1331_v1 }
  0xa6   : > { %937 = vmatpush3.bf16.msra.mxu0 %v1096_v6 }
  0xa7   : > { %938 = vmatprep.subr.bf16.mxu0 %v1331_v1 }
  0xaa   : > { %939 = vmatpush3.bf16.msra.mxu0 %v1097_v7 }
  0xab   : > { %940 = vmatprep.subr.bf16.mxu0 %v1331_v1 }
  0xae   : > { %941 = vmatpush3.bf16.msra.mxu0 %v1098_v8 }
  0xb1   : > { %943 = vmatmul.mubr.bf16.vlgmr.msra.gmra.mrb[0].mxu0 %v374_v11 }
 0x184   : > { %v480_v13 = vpop.f32.mrb[0].mxu0 }
 0x185   : > { %v481_v14 = vadd.f32 %v866_v12, %v480_v13  ;;  %v944_v15 = vpop.f32.mrb[1].mxu0 }
 0x186   : > { %v483_v16 = vpop.f32.mrb[2].mxu0 }
 0x187   : > { %vm487_vm1 = vcmp.gt.f32.partialorder %v481_v14, 0.0  ;;  %v489_v17 = vmul.f32 0.01, %v481_v14  ;;  %v484_v18 = vadd.f32 %v866_v12, %v483_v16  ;;  %v945_v19 = vpop.f32.mrb[3].mxu0 }
 0x189   : > { %v491_v20 = vsel %vm487_vm1, %v481_v14, %v489_v17  ;;  %vm488_vm2 = vcmp.gt.f32.partialorder %v484_v18, 0.0  ;;  %v490_v21 = vmul.f32 0.01, %v484_v18 }
 0x18a   : > { %493 = vst [vmem:[#allocation2] sm:$0xff] %v491_v20 }
 0x18b   : > { %v492_v22 = vsel %vm488_vm2, %v484_v18, %v490_v21 }
 0x18c   : > { %494 = vst [vmem:[#allocation2 + $0x8] sm:$0xff] %v492_v22 }
 0x18d PF: > { %v1099_v23 = vld [vmem:[%s1569_s22] sm:$0xff]   ;;  %v1333_v24 = vmov 0.0   ;;  %v1100_v25 = vld [vmem:[%s1569_s22 + $0x8] sm:$0xff]   ;;  %vm1334_vm3 = vmmov 0   ;;  %v1101_v26 = vld [vmem:[%s1569_s22 + $0x10] sm:$0xff]   ;;  %p884_p10 = scmp.ne.s32.totalorder %s1313_s27, 1 }
 0x18e   : > { %946 = vmatprep.subr.bf16.mxu0 %v1333_v24  ;;  %962 = vmatprep.mubr.msk.bf16.mxu0 %vm1334_vm3, %v1333_v24  ;;  %v1102_v27 = vld [vmem:[%s1569_s22 + $0x18] sm:$0xff]   ;;  %v1103_v28 = vld [vmem:[%s1569_s22 + $0x20] sm:$0xff]   ;;  %v1104_v29 = vld [vmem:[%s1569_s22 + $0x28] sm:$0xff]   ;;  %v1335_v47 = vmov (!%p884_p10), 0.0   ;;  %vm1336_vm6 = vmmov (!%p884_p10), 0   ;;  %s1680_s19 = sld [smem:[#allocation17_spill]] (!%p884_p10) }
 0x18f   : > { %947 = vmatpush3.bf16.msra.mxu0 %v1099_v23  ;;  %v1105_v30 = vld [vmem:[%s1569_s22 + $0x30] sm:$0xff]   ;;  %v1106_v31 = vld [vmem:[%s1569_s22 + $0x38] sm:$0xff]   ;;  %v875_v35 = vld [vmem:[%s365_s10] ss:$0 sm:$0xff] }
 0x190   : > { %948 = vmatprep.subr.bf16.mxu0 %v1333_v24  ;;  %v1107_v46 = vld [vmem:[#allocation9] sm:$0xff] (!%p884_p10)   ;;  %v1108_v48 = vld [vmem:[#allocation9 + $0x8] sm:$0xff] (!%p884_p10)   ;;  %v1109_v49 = vld [vmem:[#allocation9 + $0x10] sm:$0xff] (!%p884_p10)  }
 0x191   : > { %v495_v32 = vld [vmem:[#allocation2] sm:$0xff]  ;;  %v1110_v50 = vld [vmem:[#allocation9 + $0x18] sm:$0xff] (!%p884_p10)   ;;  %v1112_v52 = vld [vmem:[#allocation9 + $0x28] sm:$0xff] (!%p884_p10)  }
 0x192   : > { %v1111_v51 = vld [vmem:[#allocation9 + $0x20] sm:$0xff] (!%p884_p10)   ;;  %v1113_v53 = vld [vmem:[#allocation9 + $0x30] sm:$0xff] (!%p884_p10)   ;;  %v1114_v54 = vld [vmem:[#allocation9 + $0x38] sm:$0xff] (!%p884_p10)  }
 0x193   : > { %949 = vmatpush3.bf16.msra.mxu0 %v1100_v25  ;;  %v496_v33 = vld [vmem:[#allocation2 + $0x8] sm:$0xff] }
 0x194   : > { %950 = vmatprep.subr.bf16.mxu0 %v1333_v24  ;;  %v497_v34 = vpack.c.bf16 %v496_v33, %v495_v32  ;;  %v885_v58 = vld [vmem:[%s1680_s19] ss:$0 sm:$0xff] (!%p884_p10) }
 0x197   : > { %951 = vmatpush3.bf16.msra.mxu0 %v1101_v26 }
 0x198   : > { %952 = vmatprep.subr.bf16.mxu0 %v1333_v24 }
 0x19b   : > { %953 = vmatpush3.bf16.msra.mxu0 %v1102_v27 }
 0x19c   : > { %954 = vmatprep.subr.bf16.mxu0 %v1333_v24 }
 0x19f   : > { %955 = vmatpush3.bf16.msra.mxu0 %v1103_v28 }
 0x1a0   : > { %956 = vmatprep.subr.bf16.mxu0 %v1333_v24 }
 0x1a3   : > { %957 = vmatpush3.bf16.msra.mxu0 %v1104_v29 }
 0x1a4   : > { %958 = vmatprep.subr.bf16.mxu0 %v1333_v24 }
 0x1a7   : > { %959 = vmatpush3.bf16.msra.mxu0 %v1105_v30 }
 0x1a8   : > { %960 = vmatprep.subr.bf16.mxu0 %v1333_v24 }
 0x1ab   : > { %961 = vmatpush3.bf16.msra.mxu0 %v1106_v31 }
 0x1ac   : > { %966 = vmatprep.subr.bf16.mxu0 (!%p884_p10), %v1335_v47 }
 0x1ae   : > { %963 = vmatmul.mubr.bf16.vlgmr.msra.gmra.mrb[0].mxu0 %v497_v34 }
 0x1af   : > { %967 = vmatpush3.bf16.msra.mxu0 (!%p884_p10), %v1107_v46  ;;  %982 = vmatprep.mubr.msk.bf16.mxu0 (!%p884_p10), %vm1336_vm6, %v1335_v47 }
 0x1b0   : > { %968 = vmatprep.subr.bf16.mxu0 (!%p884_p10), %v1335_v47 }
 0x1b3   : > { %969 = vmatpush3.bf16.msra.mxu0 (!%p884_p10), %v1108_v48 }
 0x1b4   : > { %970 = vmatprep.subr.bf16.mxu0 (!%p884_p10), %v1335_v47 }
 0x1b7   : > { %971 = vmatpush3.bf16.msra.mxu0 (!%p884_p10), %v1109_v49 }
 0x1b8   : > { %972 = vmatprep.subr.bf16.mxu0 (!%p884_p10), %v1335_v47 }
 0x1bb   : > { %973 = vmatpush3.bf16.msra.mxu0 (!%p884_p10), %v1110_v50 }
 0x1bc   : > { %974 = vmatprep.subr.bf16.mxu0 (!%p884_p10), %v1335_v47 }
 0x1bf   : > { %975 = vmatpush3.bf16.msra.mxu0 (!%p884_p10), %v1111_v51 }
 0x1c0   : > { %976 = vmatprep.subr.bf16.mxu0 (!%p884_p10), %v1335_v47 }
 0x1c3   : > { %977 = vmatpush3.bf16.msra.mxu0 (!%p884_p10), %v1112_v52 }
 0x1c4   : > { %978 = vmatprep.subr.bf16.mxu0 (!%p884_p10), %v1335_v47 }
 0x1c7   : > { %979 = vmatpush3.bf16.msra.mxu0 (!%p884_p10), %v1113_v53 }
 0x1c8   : > { %980 = vmatprep.subr.bf16.mxu0 (!%p884_p10), %v1335_v47 }
 0x1cb   : > { %981 = vmatpush3.bf16.msra.mxu0 (!%p884_p10), %v1114_v54 }
 0x281   : > { %v603_v36 = vpop.f32.mrb[0].mxu0 }
 0x282   : > { %v604_v37 = vadd.f32 %v875_v35, %v603_v36  ;;  %v964_v38 = vpop.f32.mrb[1].mxu0 }
 0x283   : > { %v606_v39 = vpop.f32.mrb[2].mxu0  ;;  %621 = sbr.rel (%p884_p10) target bundleno = 876 (0x36c), region = 72 }
 0x284   : > { %vm610_vm4 = vcmp.gt.f32.partialorder %v604_v37, 0.0  ;;  %v612_v40 = vmul.f32 0.01, %v604_v37  ;;  %v607_v41 = vadd.f32 %v875_v35, %v606_v39  ;;  %v965_v42 = vpop.f32.mrb[3].mxu0 }
 0x286   : > { %v614_v43 = vsel %vm610_vm4, %v604_v37, %v612_v40  ;;  %vm611_vm5 = vcmp.gt.f32.partialorder %v607_v41, 0.0  ;;  %v613_v44 = vmul.f32 0.01, %v607_v41 }
 0x287   : > { %616 = vst [vmem:[#allocation2] sm:$0xff] %v614_v43 }
 0x288   : > { %v615_v45 = vsel %vm611_vm5, %v607_v41, %v613_v44 }
 0x289   : > { %617 = vst [vmem:[#allocation2 + $0x8] sm:$0xff] %v615_v45 }
 0x28e   : > { %v622_v55 = vld [vmem:[#allocation2] sm:$0xff] }
 0x290   : > { %v623_v56 = vld [vmem:[#allocation2 + $0x8] sm:$0xff] }
 0x291   : > { %v624_v57 = vpack.c.bf16 %v623_v56, %v622_v55 }
 0x293   : > { %983 = vmatmul.mubr.bf16.vlgmr.msra.gmra.mrb[0].mxu0 %v624_v57 }
 0x366   : > { %v730_v59 = vpop.f32.mrb[0].mxu0 }
 0x367   : > { %v731_v60 = vadd.f32 %v885_v58, %v730_v59  ;;  %v984_v61 = vpop.f32.mrb[1].mxu0 }
 0x368   : > { %v733_v62 = vpop.f32.mrb[2].mxu0 }
 0x369   : > { %737 = vst [vmem:[#allocation10] sm:$0xff] %v731_v60  ;;  %v734_v63 = vadd.f32 %v885_v58, %v733_v62  ;;  %v985_v0 = vpop.f32.mrb[3].mxu0 }
 0x36b   : > { %738 = vst [vmem:[#allocation10 + $0x8] sm:$0xff] %v734_v63 }
 0x36c PF: > { %p1025_p12 = scmp.eq.s32.totalorder %s1409_s30, 1  ;;  %s1337_s7 = smov [#allocation10]  }
 0x36d   : > { %s748_s21 = sshll.u32 %s1337_s7, 4  ;;  %s749_s21 = int_to_ptr.vmem [resolvable:$true] %s748_s21 }
 0x36e   : > { %s1229_s14 = scalar_lea.vmem %s749_s21, 256  ;;  %p1236_p13 = scmp.lt.s32.totalorder %s749_s21, %s749_s21 }
 0x36f   : > { %p1230_p1 = scmp.ne.s32.totalorder %s749_s21, %s1229_s14  ;;  %p1237_p4 = scmp.lt.s32.totalorder %s1229_s14, %s1229_s14 }
 0x371   : > { %p1231_p2 = pnand %p1230_p1, %p1025_p12  ;;  %p1238_p5 = por %p1237_p4, %p1236_p13 }
 0x373   : > { %p1232_p8 = pneg %p1231_p2 }
 0x375   : > { %p1239_p6 = pnand %p1238_p5, %p1232_p8 }
 0x377   : > { %1242 = shalt.err (!%p1239_p6)
}
 0x378   : > { %s1681_s24 = sld [smem:[#allocation18_spill]] }
 0x37e   : > { %s1682_s9 = smov %s1681_s24  ;;  %s1243_s22 = scalar_lea.hbm %s1681_s24, 256 }
 0x37f   : > { %p1244_p7 = scmp.ne.s32.totalorder %s1682_s9, %s1243_s22  ;;  %p1249_p0 = scmp.lt.u32.totalorder %s1243_s22, %s1682_s9 }
 0x381   : > { %p1245_p9 = pnand %p1244_p7, %p1025_p12 }
 0x383   : > { %p1246_p11 = pneg %p1245_p9 }
 0x385   : > { %p1251_p3 = pnand %p1249_p0, %p1246_p11 }
 0x387   : > { %1254 = shalt.err (!%p1251_p3)
}
 0x388   : > { %s1338_s8 = smov 128   ;;  %s1339_s17 = smov 8  }
 0x389   : > { %1001 = dma.vmem_to_hbm [thread:$0]  (%p1025_p12), %s749_s21, 256, %s1682_s9, [#allocation5], %s1338_s8, %s1338_s8, %s1339_s17  }
 0x38a   : > { %1296 = dma.done.wait (%p1025_p12), [#allocation5], 256  }
 0x38b   : > { %1298 = vsyncadd (%p1025_p12), [#allocation5], 4294967040 }
 0x38c PF: > { %s20_s29 = sadd.s32 1, %s1321_s29   ;;  %s1683_s24 = smov %s1305_s25 }
 0x38d   : > { %p17_p10 = scmp.ge.s32.totalorder %s20_s29, 4   ;;  %s1684_s25 = smov %s1309_s26 }
 0x38e   : > { %s1685_s26 = smov %s1522_s16  ;;  %s1686_s27 = smov %s1317_s28 }
 0x38f   : > { %s1687_s28 = smov %s1689_s15  ;;  %19 = sbr.rel (!%p17_p10) target bundleno = 9 (0x9), region = 109 }
 0x396   :  { %764 = vsyncpa [#allocation4], 1 }
 0x397   :  { %766 = vsyncpa [#allocation4 + $0x1], 1 }
 0x398   :  { %767 = vsyncpa [#allocation7], 1 }
 0x399   :  { %768 = vsyncpa [#allocation5], 1 }
 0x39a   :  { %770 = vsyncpa [#allocation5 + $0x1], 1 }

</bundles_post_ra>
